<compile_context>
chip_gen: v5e
topology: v5e:2x2
jax: 0.10.0
libtpu: 0.0.40
codegen_flags: <defaults>
</compile_context>

<pallas_src>
import jax
import jax.numpy as jnp
from jax.experimental import pallas as pl
from jax.experimental.pallas import tpu as pltpu


def _vae_kernel(x_ref, wmu_ref, wlv_ref, eps_ref, z_ref, mu_ref, lv_ref):
    # Cast to bf16 in-vreg right before the MXU dot (no wrapper staging pass).
    x = x_ref[...].astype(jnp.bfloat16)                       # (TM, dim_in)
    mu = jnp.dot(x, wmu_ref[...], preferred_element_type=jnp.float32)
    log_var = jnp.dot(x, wlv_ref[...], preferred_element_type=jnp.float32)
    std = jnp.exp(0.5 * log_var)                              # EUP, f32
    z = eps_ref[...] * std + mu                               # VPU fma, f32
    z_ref[...] = z.astype(z_ref.dtype)
    mu_ref[...] = mu.astype(mu_ref.dtype)
    lv_ref[...] = log_var.astype(lv_ref.dtype)


def prepare_vae_params(weight, dtype=jnp.bfloat16):
    """One-time preprocessing of the PyTorch Linear weight (2*latent, dim_in):
    transpose + split + cast, hoisted out of the per-call hot path."""
    two_latent, _ = weight.shape
    latent = two_latent // 2
    w_t = jnp.transpose(weight)                               # (dim_in, 2*latent)
    return (w_t[:, :latent].astype(dtype),                    # w_mu^T
            w_t[:, latent:].astype(dtype))                    # w_log_var^T


def _pick_tm(M, dim_in, latent, tm_max, vmem_block_budget):
    """Largest row tile (multiple of 16) whose double-buffered streams fit the
    VMEM budget; a single full-extent block if M already fits."""
    # f32 x + f32 eps + 3 outputs (<=4 B/elem), each double-buffered.
    bytes_per_row = 2 * (dim_in * 4 + latent * 4 + 3 * latent * 4)
    tm = min(tm_max, max(16, vmem_block_budget // bytes_per_row))
    tm = max(16, (tm // 16) * 16)        # bf16-output sublane tile
    return M if tm >= M else tm


def vanilla_vae_forward(x, w_mu_t, w_lv_t, *, eps=None, key=None,
                        out_dtype=jnp.bfloat16, tm=8192):
    """x: (B, T, dim_in) f32; w_mu_t / w_lv_t: (dim_in, latent) from
    prepare_vae_params; eps: optional (B, T, latent) standard-normal noise in
    f32 (if None it is drawn from `key`, default PRNGKey(0)).
    Returns (z, mu, log_var), each (B, T, latent) in out_dtype."""
    B, T, dim_in = x.shape
    dim_in_w, latent = w_mu_t.shape
    assert dim_in == dim_in_w and w_lv_t.shape == (dim_in, latent)

    M = B * T
    x2 = x.reshape(M, dim_in)                          # free view, stays f32
    if eps is None:
        # TODO(synk): torch.randn_like's exact RNG stream cannot be reproduced;
        # on-chip pltpu.prng_seed/stateful_normal would drop this HBM stream
        # entirely but does not lower under the CPU/interpret harness.
        key = jax.random.PRNGKey(0) if key is None else key
        eps2 = jax.random.normal(key, (M, latent), dtype=jnp.float32)
    else:
        eps2 = eps.reshape(M, latent).astype(jnp.float32)   # no-op when f32

    TM = _pick_tm(M, dim_in, latent, tm, vmem_block_budget=40 * 1024 * 1024)
    num_tiles = pl.cdiv(M, TM)                         # ragged last block is OK

    out_shape = tuple(jax.ShapeDtypeStruct((M, latent), out_dtype)
                      for _ in range(3))
    row_block = lambda i: (i, 0)
    resident = pl.BlockSpec((dim_in, latent), lambda i: (0, 0))  # VMEM-resident

    z2, mu2, lv2 = pl.pallas_call(
        _vae_kernel,
        out_shape=out_shape,
        grid_spec=pltpu.PrefetchScalarGridSpec(
            num_scalar_prefetch=0,
            grid=(num_tiles,),
            in_specs=[
                pl.BlockSpec((TM, dim_in), row_block),   # x, f32
                resident,                                # w_mu^T, bf16
                resident,                                # w_log_var^T, bf16
                pl.BlockSpec((TM, latent), row_block),   # eps, f32
            ],
            out_specs=[
                pl.BlockSpec((TM, latent), row_block),   # z
                pl.BlockSpec((TM, latent), row_block),   # mu
                pl.BlockSpec((TM, latent), row_block),   # log_var
            ],
        ),
        compiler_params=pltpu.CompilerParams(
            dimension_semantics=("parallel",),           # megacore on v7x
            vmem_limit_bytes=48 * 1024 * 1024),
    )(x2, w_mu_t, w_lv_t, eps2)

    def _view(a):
        return a.reshape(B, T, latent)                   # free view, no copy

    return _view(z2), _view(mu2), _view(lv2)


if __name__ == "__main__":
    B, T = 2, 8
    dim_in = 32
    latent_dim = 16

    key = jax.random.PRNGKey(0)
    kx, kw, ke, kn = jax.random.split(key, 4)

    x = jax.random.normal(kx, (B, T, dim_in), dtype=jnp.float32)
    # Deterministic init of nn.Linear(dim_in, 2*latent_dim, bias=False) weight.
    bound = 1.0 / (dim_in ** 0.5)
    weight = jax.random.uniform(kw, (2 * latent_dim, dim_in),
                                minval=-bound, maxval=bound, dtype=jnp.float32)
    eps = jax.random.normal(ke, (B, T, latent_dim), dtype=jnp.float32)

    # One-time weight preprocessing (hoisted out of the forward hot path).
    w_mu_t, w_lv_t = prepare_vae_params(weight)

    # Reference mirroring the kernel numerics (bf16 matmul inputs, f32 rest).
    hi = jax.lax.Precision.HIGHEST
    x_bf = x.astype(jnp.bfloat16).astype(jnp.float32)
    mu_ref = jnp.einsum("btk,kl->btl", x_bf, w_mu_t.astype(jnp.float32), precision=hi)
    lv_ref = jnp.einsum("btk,kl->btl", x_bf, w_lv_t.astype(jnp.float32), precision=hi)
    z_ref = eps * jnp.exp(0.5 * lv_ref) + mu_ref

    # ---- Path A: explicit eps, f32 outputs (tight numerical check). ----
    z_a, mu_a, lv_a = vanilla_vae_forward(x, w_mu_t, w_lv_t, eps=eps,
                                          out_dtype=jnp.float32)
    jax.block_until_ready((z_a, mu_a, lv_a))
    assert jnp.allclose(mu_a, mu_ref, atol=1e-4)
    assert jnp.allclose(lv_a, lv_ref, atol=1e-4)
    assert jnp.allclose(z_a, z_ref, atol=1e-4)

    # PyTorch-semantics (pure f32) reference: bf16 matmul inputs only perturb
    # results by O(1e-3) at these scales.
    mu_f32 = jnp.einsum("btk,lk->btl", x, weight[:latent_dim], precision=hi)
    lv_f32 = jnp.einsum("btk,lk->btl", x, weight[latent_dim:], precision=hi)
    z_f32 = eps * jnp.exp(0.5 * lv_f32) + mu_f32
    assert jnp.allclose(mu_a, mu_f32, atol=5e-2)
    assert jnp.allclose(lv_a, lv_f32, atol=5e-2)
    assert jnp.allclose(z_a, z_f32, atol=5e-2)

    # ---- Path B: default path (bf16 outputs, wrapper-drawn noise). ----
    z_b, mu_b, lv_b = vanilla_vae_forward(x, w_mu_t, w_lv_t, key=kn)
    jax.block_until_ready((z_b, mu_b, lv_b))
    assert z_b.dtype == jnp.bfloat16
    eps_b = jax.random.normal(kn, (B * T, latent_dim), jnp.float32).reshape(
        B, T, latent_dim)
    z_ref_b = eps_b * jnp.exp(0.5 * lv_ref) + mu_ref
    assert jnp.allclose(mu_b.astype(jnp.float32), mu_ref, atol=5e-2)
    assert jnp.allclose(lv_b.astype(jnp.float32), lv_ref, atol=5e-2)
    assert jnp.allclose(z_b.astype(jnp.float32), z_ref_b, atol=5e-2)

    # ---- Path C: ragged grid (M=200 rows, TM=128 -> 2 blocks, last ragged). ----
    Tc = 100
    xc = jax.random.normal(jax.random.PRNGKey(1), (B, Tc, dim_in), jnp.float32)
    ec = jax.random.normal(jax.random.PRNGKey(2), (B, Tc, latent_dim), jnp.float32)
    z_c, mu_c, lv_c = vanilla_vae_forward(xc, w_mu_t, w_lv_t, eps=ec,
                                          out_dtype=jnp.float32, tm=128)
    jax.block_until_ready((z_c, mu_c, lv_c))
    xc_bf = xc.astype(jnp.bfloat16).astype(jnp.float32)
    mu_cr = jnp.einsum("btk,kl->btl", xc_bf, w_mu_t.astype(jnp.float32), precision=hi)
    lv_cr = jnp.einsum("btk,kl->btl", xc_bf, w_lv_t.astype(jnp.float32), precision=hi)
    z_cr = ec * jnp.exp(0.5 * lv_cr) + mu_cr
    assert jnp.allclose(mu_c, mu_cr, atol=1e-4)
    assert jnp.allclose(lv_c, lv_cr, atol=1e-4)
    assert jnp.allclose(z_c, z_cr, atol=1e-4)

    print("KERNEL_OK")
</pallas_src>

<mosaic_0001>
module attributes {stable_mosaic.version = 11 : i64} {
  func.func @_vae_kernel(%arg0: i32, %arg1: memref<16x32xf32, #tpu.memory_space<vmem>>, %arg2: memref<32x16xbf16, #tpu.memory_space<vmem>>, %arg3: memref<32x16xbf16, #tpu.memory_space<vmem>>, %arg4: memref<16x16xf32, #tpu.memory_space<vmem>>, %arg5: memref<16x16xf32, #tpu.memory_space<vmem>>, %arg6: memref<16x16xf32, #tpu.memory_space<vmem>>, %arg7: memref<16x16xf32, #tpu.memory_space<vmem>>) attributes {dimension_semantics = [#tpu.dimension_semantics<parallel>], iteration_bounds = array<i64: 1>, scalar_prefetch = 0 : i64, scratch_operands = 0 : i64, tpu.core_type = #tpu.core_type<tc>, window_params = [{transform_indices = @transform_0, window_bounds = array<i64: 16, 32>}, {pipeline_mode = #tpu.pipeline_mode<synchronous>, transform_indices = @transform_1, window_bounds = array<i64: 32, 16>}, {pipeline_mode = #tpu.pipeline_mode<synchronous>, transform_indices = @transform_2, window_bounds = array<i64: 32, 16>}, {transform_indices = @transform_3, window_bounds = array<i64: 16, 16>}, {transform_indices = @transform_4, window_bounds = array<i64: 16, 16>}, {transform_indices = @transform_5, window_bounds = array<i64: 16, 16>}, {transform_indices = @transform_6, window_bounds = array<i64: 16, 16>}]} {
    %c0 = arith.constant 0 : index
    %c0_0 = arith.constant 0 : index
    %0 = vector.load %arg1[%c0, %c0_0] : memref<16x32xf32, #tpu.memory_space<vmem>>, vector<16x32xf32>
    %1 = arith.truncf %0 : vector<16x32xf32> to vector<16x32xbf16>
    %c0_1 = arith.constant 0 : index
    %c0_2 = arith.constant 0 : index
    %2 = vector.load %arg2[%c0_1, %c0_2] : memref<32x16xbf16, #tpu.memory_space<vmem>>, vector<32x16xbf16>
    %cst = arith.constant dense<0.000000e+00> : vector<16x16xf32>
    %3 = tpu.matmul %1, %2, %cst {dimension_numbers = #tpu.dot_dimension_numbers<[1], [0], [0], [1], [0, 0, 1, 1], [], []>} : vector<16x32xbf16>, vector<32x16xbf16>, vector<16x16xf32> -> vector<16x16xf32>
    %c0_3 = arith.constant 0 : index
    %c0_4 = arith.constant 0 : index
    %4 = vector.load %arg3[%c0_3, %c0_4] : memref<32x16xbf16, #tpu.memory_space<vmem>>, vector<32x16xbf16>
    %cst_5 = arith.constant dense<0.000000e+00> : vector<16x16xf32>
    %5 = tpu.matmul %1, %4, %cst_5 {dimension_numbers = #tpu.dot_dimension_numbers<[1], [0], [0], [1], [0, 0, 1, 1], [], []>} : vector<16x32xbf16>, vector<32x16xbf16>, vector<16x16xf32> -> vector<16x16xf32>
    %cst_6 = arith.constant 5.000000e-01 : f32
    %6 = vector.broadcast %cst_6 : f32 to vector<16x16xf32>
    %7 = arith.mulf %6, %5 : vector<16x16xf32>
    %8 = math.exp %7 : vector<16x16xf32>
    %c0_7 = arith.constant 0 : index
    %c0_8 = arith.constant 0 : index
    %9 = vector.load %arg4[%c0_7, %c0_8] : memref<16x16xf32, #tpu.memory_space<vmem>>, vector<16x16xf32>
    %10 = arith.mulf %9, %8 : vector<16x16xf32>
    %11 = arith.addf %10, %3 : vector<16x16xf32>
    %c0_9 = arith.constant 0 : index
    %c0_10 = arith.constant 0 : index
    %12 = vector.load %arg5[%c0_9, %c0_10] : memref<16x16xf32, #tpu.memory_space<vmem>>, vector<16x16xf32>
    tpu.vector_store %arg5[%c0_9, %c0_10], %11 {strides = array<i32>} : memref<16x16xf32, #tpu.memory_space<vmem>>, vector<16x16xf32>,
    %c0_11 = arith.constant 0 : index
    %c0_12 = arith.constant 0 : index
    %13 = vector.load %arg6[%c0_11, %c0_12] : memref<16x16xf32, #tpu.memory_space<vmem>>, vector<16x16xf32>
    tpu.vector_store %arg6[%c0_11, %c0_12], %3 {strides = array<i32>} : memref<16x16xf32, #tpu.memory_space<vmem>>, vector<16x16xf32>,
    %c0_13 = arith.constant 0 : index
    %c0_14 = arith.constant 0 : index
    %14 = vector.load %arg7[%c0_13, %c0_14] : memref<16x16xf32, #tpu.memory_space<vmem>>, vector<16x16xf32>
    tpu.vector_store %arg7[%c0_13, %c0_14], %5 {strides = array<i32>} : memref<16x16xf32, #tpu.memory_space<vmem>>, vector<16x16xf32>,
    return
  }
  func.func @transform_0(%arg0: i32) -> (i32, i32) {
    %c0_i32 = arith.constant 0 : i32
    %c0_i32_0 = arith.constant 0 : i32
    return %arg0, %c0_i32 : i32, i32
  }
  func.func @transform_1(%arg0: i32) -> (i32, i32) {
    %c0_i32 = arith.constant 0 : i32
    %c0_i32_0 = arith.constant 0 : i32
    %c0_i32_1 = arith.constant 0 : i32
    return %c0_i32, %c0_i32_0 : i32, i32
  }
  func.func @transform_2(%arg0: i32) -> (i32, i32) {
    %c0_i32 = arith.constant 0 : i32
    %c0_i32_0 = arith.constant 0 : i32
    %c0_i32_1 = arith.constant 0 : i32
    return %c0_i32, %c0_i32_0 : i32, i32
  }
  func.func @transform_3(%arg0: i32) -> (i32, i32) {
    %c0_i32 = arith.constant 0 : i32
    %c0_i32_0 = arith.constant 0 : i32
    return %arg0, %c0_i32 : i32, i32
  }
  func.func @transform_4(%arg0: i32) -> (i32, i32) {
    %c0_i32 = arith.constant 0 : i32
    %c0_i32_0 = arith.constant 0 : i32
    return %arg0, %c0_i32 : i32, i32
  }
  func.func @transform_5(%arg0: i32) -> (i32, i32) {
    %c0_i32 = arith.constant 0 : i32
    %c0_i32_0 = arith.constant 0 : i32
    return %arg0, %c0_i32 : i32, i32
  }
  func.func @transform_6(%arg0: i32) -> (i32, i32) {
    %c0_i32 = arith.constant 0 : i32
    %c0_i32_0 = arith.constant 0 : i32
    return %arg0, %c0_i32 : i32, i32
  }
}

</mosaic_0001>

<bundles_post_ra>
// kernel: tpu_custom_call.1
= control target key start
LH: loop header
LB: loop body
LE: loop exit
PB: predicated region body
PF: predicated region fallthrough
CT: control target
= control target key end

     0   :  { %12 = vsyncpa [#allocation3], 0  ;;  %s348_s0 = inlined_call_operand.vmem [shape: f32[16,32], index: 0, kind: input, shape index: {}]   ;;  %s349_s1 = inlined_call_operand.vmem [shape: bf16[32,16], index: 1, kind: input, shape index: {}]   ;;  %s350_s2 = inlined_call_operand.vmem [shape: bf16[32,16], index: 2, kind: input, shape index: {}]   ;;  %s351_s3 = inlined_call_operand.vmem [shape: f32[16,16], index: 3, kind: input, shape index: {}]   ;;  %s352_s4 = inlined_call_operand.hbm [shape: f32[16,16], index: 4, kind: output, shape index: {0}]   ;;  %s353_s5 = inlined_call_operand.hbm [shape: f32[16,16], index: 5, kind: output, shape index: {1}]   ;;  %s354_s6 = inlined_call_operand.hbm [shape: f32[16,16], index: 6, kind: output, shape index: {2}]  }
   0x1   :  { %v183_v0 = vld [vmem:[%s350_s2 + $0x8] sm:$0xff]  ;;  %v182_v2 = vld [vmem:[%s350_s2] sm:$0xff] }
   0x2   :  { %v181_v1 = vld [vmem:[%s349_s1 + $0x8] sm:$0xff]  ;;  %v23_v3 = vld [vmem:[%s348_s0] sm:$0xff]  ;;  %82 = vmatpush.bf16.msra.mxu1 %v183_v0 }
   0x3   :  { %52 = vmatpush.bf16.msra.mxu0 %v181_v1  ;;  %v24_v4 = vld [vmem:[%s348_s0 + $0x8] sm:$0xff]  ;;  %v180_v5 = vld [vmem:[%s349_s1] sm:$0xff] }
   0x4   :  { %13 = vsyncpa [#allocation5], 0  ;;  %v25_v6 = vpack.c.bf16 %v24_v4, %v23_v3  ;;  %vm42_vm0 = vcmask 261120   ;;  %vm102_vm1 = vcmask 130048   ;;  %s269_s0 = smov [#allocation4]   ;;  %s128_s10 = sshll.u32 %s353_s5, 4  ;;  %s129_s10 = int_to_ptr.hbm [resolvable:$true] %s128_s10 }
   0x5   :  { %s126_s2 = sshll.u32 %s269_s0, 4  ;;  %s270_s11 = smov [#allocation6]   ;;  %v96_v13 = vld [vmem:[%s351_s3] sm:$0xff]  ;;  %v97_v19 = vld [vmem:[%s351_s3 + $0x8] sm:$0xff]  ;;  %s127_s2 = int_to_ptr.vmem [resolvable:$true] %s126_s2 }
   0x6   :  { %83 = vmatpush.bf16.msra.mxu1 %v182_v2  ;;  %s139_s12 = sshll.u32 %s270_s11, 4  ;;  %s141_s15 = sshll.u32 %s354_s6, 4  ;;  %s140_s12 = int_to_ptr.vmem [resolvable:$true] %s139_s12  ;;  %s142_s15 = int_to_ptr.hbm [resolvable:$true] %s141_s15 }
   0x7   :  { %53 = vmatpush.bf16.msra.mxu0 %v180_v5  ;;  %s271_s5 = smov 128   ;;  %s272_s18 = smov 8  }
   0x8   :  { %s273_s20 = smov [#allocation2]   ;;  %s115_s24 = sshll.u32 %s352_s4, 4  ;;  %s116_s24 = int_to_ptr.hbm [resolvable:$true] %s115_s24 }
   0x9   :  { %179 = vmatmul.msk.bf16.vlgmr.msra.gmra.mxu1 %vm42_vm0, %v25_v6  ;;  %s113_s21 = sshll.u32 %s273_s20, 4  ;;  %s114_s21 = int_to_ptr.vmem [resolvable:$true] %s113_s21 }
   0xa   :  { %170 = vmatmul.msk.bf16.vlgmr.msra.gmra.mxu0 %vm42_vm0, %v25_v6 }
  0x86   :  { %v85_v7 = vpop.f32.mrf.mxu1 }
  0x87   :  { %v55_v8 = vpop.f32.mrf.mxu0  ;;  %v90_v9 = vmul.f32 0.5, %v85_v7  ;;  %107 = vst.msk [vmem:[#allocation6] sm:$0xff] %vm102_vm1, %v85_v7 }
  0x88   :  { %105 = vst.msk [vmem:[#allocation4] sm:$0xff] %vm102_vm1, %v55_v8 }
  0x89   :  { %v92_v10 = vmul.f32 1.442695, %v90_v9 }
  0x8b   :  { %189 = vpow2.f32 %v92_v10 }
  0x8e   :  { %v87_v11 = vpop.f32.mrf.mxu1 }
  0x8f   :  { %v57_v12 = vpop.f32.mrf.mxu0  ;;  %v91_v14 = vmul.f32 0.5, %v87_v11  ;;  %108 = vst.msk [vmem:[#allocation6 + $0x8] sm:$0xff] %vm102_vm1, %v87_v11 }
  0x90   :  { %106 = vst.msk [vmem:[#allocation4 + $0x8] sm:$0xff] %vm102_vm1, %v57_v12 }
  0x91   :  { %v190_v15 = vpop.eup %189  ;;  %v94_v16 = vmul.f32 1.442695, %v91_v14  ;;  %134 = dma.vmem_to_hbm [thread:$0]  %s127_s2, 256, %s129_s10, [#allocation5], %s271_s5, %s271_s5, %s272_s18  }
  0x92   :  { %v98_v17 = vmul.f32 %v190_v15, %v96_v13  ;;  %147 = dma.vmem_to_hbm [thread:$0]  %s140_s12, 256, %s142_s15, [#allocation5], %s271_s5, %s271_s5, %s272_s18  }
  0x93   :  { %191 = vpow2.f32 %v94_v16 }
  0x94   :  { %v100_v18 = vadd.f32 %v98_v17, %v55_v8 }
  0x96   :  { %103 = vst.msk [vmem:[#allocation2] sm:$0xff] %vm102_vm1, %v100_v18 }
  0x99   :  { %v192_v20 = vpop.eup %191 }
  0x9a   :  { %v99_v21 = vmul.f32 %v192_v20, %v97_v19 }
  0x9c   :  { %v101_v22 = vadd.f32 %v99_v21, %v57_v12 }
  0x9e   :  { %104 = vst.msk [vmem:[#allocation2 + $0x8] sm:$0xff] %vm102_vm1, %v101_v22 }
  0x9f   :  { %121 = dma.vmem_to_hbm [thread:$0]  %s114_s21, 256, %s116_s24, [#allocation3], %s271_s5, %s271_s5, %s272_s18  }
  0xa0   :  { %265 = dma.done.wait [#allocation3], 256  }
  0xa1   :  { %266 = vsyncadd [#allocation3], 4294967040 }
  0xa2   :  { %267 = dma.done.wait [#allocation5], 512  }
  0xa3   :  { %268 = vsyncadd [#allocation5], 4294966784 }
  0xa4   :  { %160 = vsyncpa [#allocation3], 1 }
  0xa5   :  { %161 = vsyncpa [#allocation5], 1 }

</bundles_post_ra>
